<compile_context>
chip_gen: v7x
topology: tpu7x:2x2x1
jax: 0.10.0
libtpu: 0.0.40
codegen_flags: <defaults>
</compile_context>

<pallas_src>
import jax
import jax.numpy as jnp
from jax.experimental import pallas as pl
from jax.experimental.pallas import tpu as pltpu

_MIB = 1024 * 1024


def _round_up(x, m):
    return ((x + m - 1) // m) * m


def _vmem_limit_bytes():
    """Generation-aware scoped-VMEM request (~70% of physical, capped at 64 MiB)."""
    phys = 64 * _MIB  # conservative default (v7x per-TensorCore VMEM)
    try:
        cap = getattr(pltpu.get_tpu_info(), "vmem_capacity_bytes", None)
        if cap:
            phys = int(cap)
    except Exception:
        pass
    # v5e/v6e (128 MiB physical) -> 64 MiB; v7x (64 MiB physical) -> ~44 MiB.
    return int(min(phys * 7 // 10, 64 * _MIB))


def _choose_tiles(rows, cols, itemsize, mask_itemsize, data_budget):
    """Pick (tile_r, tile_c) so the double-buffered (x-in + out + lane-padded
    mask) footprint fits data_budget, blocks are as large as possible (per-step
    overhead ~0.35 us), and there are >=2 grid steps when feasible (v7x megacore)."""
    if itemsize >= 4:
        row_align = 8
    elif itemsize == 2:
        row_align = 16
    else:
        row_align = 32

    def per_row_bytes(tc):
        # 2 pipeline buffers x (input block row + output block row + 128-lane mask row).
        return 2 * (tc * itemsize * 2 + 128 * mask_itemsize)

    tile_c = cols                                  # full width (== full dim: legal)
    max_r = data_budget // per_row_bytes(tile_c)
    if max_r < row_align:
        # Even one aligned row strip at full width blows the budget: split columns.
        strip_budget = data_budget // row_align
        tc_max = (strip_budget // 2 - 128 * mask_itemsize) // (2 * itemsize)
        tile_c = max((tc_max // 128) * 128, 128)
        max_r = max(data_budget // per_row_bytes(tile_c), row_align)

    if rows <= max_r:
        tile_r = rows                              # single row block (full-dim rule)
    else:
        tile_r = max((max_r // row_align) * row_align, row_align)

    # Guarantee >=2 grid steps when possible so both v7x TensorCores get work
    # (harmless on single-TC v5e/v6e).
    if pl.cdiv(rows, tile_r) * pl.cdiv(cols, tile_c) < 2:
        if tile_r >= 2 * row_align:
            tile_r = _round_up(pl.cdiv(tile_r, 2), row_align)
        elif tile_c >= 256:
            tile_c = _round_up(pl.cdiv(tile_c, 2), 128)
    return tile_r, tile_c


def _bindropout_kernel(thr_ref, x_ref, m_ref, o_ref):
    """One (tile_r, tile_c) elementwise block.

    thr_ref: (1, 1) f32 scalar in SMEM -- binarization threshold.
    x_ref:   (tile_r, tile_c) input block in VMEM.
    m_ref:   (tile_r, 1) per-row channel-select value (>0.5 => binarize, else ReLU).
    """
    x = x_ref[...]
    thr = thr_ref[0, 0].astype(x.dtype)          # compare in x's dtype (no f32 upcast)
    sel = m_ref[...] > 0.5                       # (tile_r, 1) -> broadcasts over lanes
    binarized = (x > thr).astype(x.dtype)        # selected channels: 1.0 / 0.0
    relu_out = jnp.maximum(x, 0)                 # unselected channels: ReLU
    o_ref[...] = jnp.where(sel, binarized, relu_out).astype(o_ref.dtype)


def bin_dropout(x, channel_mask, bin_threshold=0.0):
    """x: (N, C, H, W) float; channel_mask: (C,) {0,1} per-channel Bernoulli draw."""
    N, C, H, W = x.shape
    rows, cols = N * C, H * W
    itemsize = jnp.dtype(x.dtype).itemsize

    x2 = x.reshape(rows, cols)

    # Narrow spatial only: pad the lane dim up to one full vreg (128). For
    # cols >= 128 we keep the ragged width and let Pallas mask the trailing
    # partial block -- no extra HBM pad/de-pad pass.
    cols_eff = cols
    if cols < 128:
        cols_eff = 128
        x2 = jnp.pad(x2, ((0, 0), (0, cols_eff - cols)))

    # Per-channel mask broadcast over batch -> one value per row, stored in
    # x.dtype so its lane-padded VMEM block stays cheap and alignment matches x.
    mask_dtype = x.dtype
    m2 = jnp.broadcast_to(
        channel_mask.astype(mask_dtype)[None, :], (N, C)
    ).reshape(rows, 1)

    thr = jnp.full((1, 1), bin_threshold, dtype=jnp.float32)

    vmem_limit = _vmem_limit_bytes()
    data_budget = vmem_limit - max(vmem_limit // 8, 2 * _MIB)  # compiler-scratch headroom
    tile_r, tile_c = _choose_tiles(
        rows, cols_eff, itemsize, jnp.dtype(mask_dtype).itemsize, data_budget
    )
    grid = (pl.cdiv(rows, tile_r), pl.cdiv(cols_eff, tile_c))

    # TODO(synk): when the caller can donate x, add input_output_aliases={1: 0}
    # to reuse its HBM buffer for the output (halves peak HBM footprint).
    out2 = pl.pallas_call(
        _bindropout_kernel,
        out_shape=jax.ShapeDtypeStruct((rows, cols_eff), x.dtype),
        grid_spec=pltpu.PrefetchScalarGridSpec(
            num_scalar_prefetch=0,
            grid=grid,
            in_specs=[
                pl.BlockSpec(memory_space=pltpu.MemorySpace.SMEM),    # threshold
                pl.BlockSpec((tile_r, tile_c), lambda i, j: (i, j)),  # x tile
                pl.BlockSpec((tile_r, 1), lambda i, j: (i, 0)),       # mask column
            ],
            out_specs=pl.BlockSpec((tile_r, tile_c), lambda i, j: (i, j)),
        ),
        compiler_params=pltpu.CompilerParams(
            dimension_semantics=("parallel", "parallel"),
            vmem_limit_bytes=vmem_limit,
        ),
    )(thr, x2, m2)

    if cols_eff != cols:
        out2 = out2[:, :cols]
    return out2.reshape(N, C, H, W)


def bin_dropout_ref(x, channel_mask, bin_threshold=0.0):
    m = channel_mask.astype(bool)[None, :, None, None]
    # Same precision path as the kernel: f32 threshold cast to x.dtype.
    thr = jnp.asarray(bin_threshold, dtype=jnp.float32).astype(x.dtype)
    binarized = (x > thr).astype(x.dtype)
    return jnp.where(m, binarized, jnp.maximum(x, 0))


if __name__ == "__main__":
    key = jax.random.PRNGKey(0)
    kx, km, kx2, km2 = jax.random.split(key, 4)
    binarization_rate = 0.5

    # Case 1: lane-aligned spatial (16x16 = 256), f32. Exercises the unpadded
    # path and the megacore column split (grid becomes (1, 2)).
    N, C, H, W = 2, 4, 16, 16
    x = jax.random.normal(kx, (N, C, H, W), dtype=jnp.float32)
    channel_mask = jax.random.bernoulli(
        km, p=binarization_rate, shape=(C,)
    ).astype(jnp.int32)
    out = jax.block_until_ready(bin_dropout(x, channel_mask, bin_threshold=0.0))
    ref = bin_dropout_ref(x, channel_mask, bin_threshold=0.0)
    assert out.shape == (N, C, H, W)
    assert jnp.allclose(out, ref, atol=1e-6), "mismatch vs reference (case 1)"

    # Case 2: narrow spatial (7x7 = 49) in bf16 exercises the lane-padding
    # fallback, 16-row sublane alignment and the bf16 threshold compare.
    N2, C2, H2, W2 = 2, 8, 7, 7
    x_b = jax.random.normal(kx2, (N2, C2, H2, W2), dtype=jnp.bfloat16)
    channel_mask_b = jax.random.bernoulli(
        km2, p=binarization_rate, shape=(C2,)
    ).astype(jnp.int32)
    out_b = jax.block_until_ready(bin_dropout(x_b, channel_mask_b, bin_threshold=0.1))
    ref_b = bin_dropout_ref(x_b, channel_mask_b, bin_threshold=0.1)
    assert out_b.shape == (N2, C2, H2, W2)
    assert jnp.allclose(
        out_b.astype(jnp.float32), ref_b.astype(jnp.float32), atol=1e-6
    ), "mismatch vs reference (case 2)"

    print("KERNEL_OK")
</pallas_src>

<mosaic_0001>
module attributes {stable_mosaic.version = 11 : i64} {
  func.func @_bindropout_kernel(%arg0: i32, %arg1: i32, %arg2: memref<1x1xf32, #tpu.memory_space<smem>>, %arg3: memref<8x128xf32, #tpu.memory_space<vmem>>, %arg4: memref<8x1xf32, #tpu.memory_space<vmem>>, %arg5: memref<8x128xf32, #tpu.memory_space<vmem>>) attributes {dimension_semantics = [#tpu.dimension_semantics<parallel>, #tpu.dimension_semantics<parallel>], iteration_bounds = array<i64: 1, 2>, scalar_prefetch = 0 : i64, scratch_operands = 0 : i64, tpu.core_type = #tpu.core_type<tc>, window_params = [{transform_indices = @transform_0, window_bounds = array<i64: 1, 1>}, {transform_indices = @transform_1, window_bounds = array<i64: 8, 128>}, {transform_indices = @transform_2, window_bounds = array<i64: 8, 1>}, {transform_indices = @transform_3, window_bounds = array<i64: 8, 128>}]} {
    %c0 = arith.constant 0 : index
    %c0_0 = arith.constant 0 : index
    %0 = vector.load %arg3[%c0, %c0_0] : memref<8x128xf32, #tpu.memory_space<vmem>>, vector<8x128xf32>
    %c0_1 = arith.constant 0 : index
    %c0_2 = arith.constant 0 : index
    %1 = memref.load %arg2[%c0_1, %c0_2] : memref<1x1xf32, #tpu.memory_space<smem>>
    %c0_3 = arith.constant 0 : index
    %c0_4 = arith.constant 0 : index
    %2 = vector.load %arg4[%c0_3, %c0_4] : memref<8x1xf32, #tpu.memory_space<vmem>>, vector<8x1xf32>
    %cst = arith.constant 5.000000e-01 : f32
    %3 = vector.broadcast %cst : f32 to vector<8x1xf32>
    %4 = arith.cmpf ogt, %2, %3 : vector<8x1xf32>
    %5 = vector.broadcast %1 : f32 to vector<8x128xf32>
    %6 = arith.cmpf ogt, %0, %5 : vector<8x128xf32>
    %7 = arith.extui %6 : vector<8x128xi1> to vector<8x128xi32>
    %8 = arith.sitofp %7 : vector<8x128xi32> to vector<8x128xf32>
    %cst_5 = arith.constant 0.000000e+00 : f32
    %9 = vector.broadcast %cst_5 : f32 to vector<8x128xf32>
    %10 = arith.maximumf %0, %9 : vector<8x128xf32>
    %11 = vector.shape_cast %4 : vector<8x1xi1> to vector<8x1xi1>
    %12 = vector.broadcast %11 : vector<8x1xi1> to vector<8x128xi1>
    %13 = arith.select %12, %8, %10 : vector<8x128xi1>, vector<8x128xf32>
    %c0_6 = arith.constant 0 : index
    %c0_7 = arith.constant 0 : index
    %14 = vector.load %arg5[%c0_6, %c0_7] : memref<8x128xf32, #tpu.memory_space<vmem>>, vector<8x128xf32>
    tpu.vector_store %arg5[%c0_6, %c0_7], %13 {strides = array<i32>} : memref<8x128xf32, #tpu.memory_space<vmem>>, vector<8x128xf32>,
    return
  }
  func.func @transform_0(%arg0: i32, %arg1: i32) -> (i32, i32) {
    %c0_i32 = arith.constant 0 : i32
    %c0_i32_0 = arith.constant 0 : i32
    %c0_i32_1 = arith.constant 0 : i32
    return %c0_i32, %c0_i32_0 : i32, i32
  }
  func.func @transform_1(%arg0: i32, %arg1: i32) -> (i32, i32) {
    %c0_i32 = arith.constant 0 : i32
    return %arg0, %arg1 : i32, i32
  }
  func.func @transform_2(%arg0: i32, %arg1: i32) -> (i32, i32) {
    %c0_i32 = arith.constant 0 : i32
    %c0_i32_0 = arith.constant 0 : i32
    return %arg0, %c0_i32 : i32, i32
  }
  func.func @transform_3(%arg0: i32, %arg1: i32) -> (i32, i32) {
    %c0_i32 = arith.constant 0 : i32
    return %arg0, %arg1 : i32, i32
  }
}

</mosaic_0001>

<bundles_post_ra>
// kernel: tpu_custom_call.1
= control target key start
LH: loop header
LB: loop body
LE: loop exit
PB: predicated region body
PF: predicated region fallthrough
CT: control target
= control target key end

     0   :  { %s747_s0 = inlined_call_operand.<no memory space> [shape: f32[1,1], index: 0, kind: input, shape index: {}]   ;;  %s748_s1 = inlined_call_operand.hbm [shape: f32[8,256], index: 1, kind: input, shape index: {}]   ;;  %s749_s2 = inlined_call_operand.vmem [shape: f32[8,1], index: 2, kind: input, shape index: {}]   ;;  %s750_s3 = inlined_call_operand.hbm [shape: f32[8,256], index: 3, kind: output, shape index: {}]  }
   0x1   :  { %8 = sst [smem:[#allocation2]] %s747_s0 }
   0x2   :  { %9 = vsyncpa [#allocation4], 0 }
   0x3   :  { %11 = vsyncpa [#allocation4 + $0x1], 0 }
   0x4   :  { %12 = vsyncpa [#allocation5], 0 }
   0x5   :  { %14 = vsyncpa [#allocation5 + $0x1], 0  ;;  %s572_s14 = smov 0   ;;  %s574_s15 = smov 0  }
   0x6   :  { %s576_s16 = smov 0   ;;  %s578_s17 = smov 0  }
   0x7   :  { %s580_s18 = smov 0   ;;  %s582_s19 = smov 0  }
   0x8 LB: > { %s351_s0 = sadd.s32 4294967295, %s543_s19   ;;  %s352_s20 = sadd.s32 4294967294, %s543_s19   ;;  %s543_s19 = sphi %s582_s19, %s20_s19   ;;  %s539_s18 = sphi %s580_s18, %s766_s18   ;;  %s535_s17 = sphi %s578_s17, %s765_s17   ;;  %s531_s16 = sphi %s576_s16, %s764_s16   ;;  %s527_s15 = sphi %s574_s15, %s763_s15   ;;  %s523_s14 = sphi %s572_s14, %s762_s14  }
   0x9   : > { %s29_s21 = sadd.s32 1, %s539_s18  ;;  %s62_s22 = sadd.s32 1, %s531_s16 }
   0xa   : > { %p30_p0 = scmp.ge.s32.totalorder %s29_s21, 2  ;;  %p69_p1 = scmp.ne.s32.totalorder %s531_s16, %s527_s15 }
   0xb   : > { %p70_p2 = scmp.eq.s32.totalorder %s543_s19, 0  ;;  %p75_p3 = scmp.ne.s32.totalorder %s527_s15, %s523_s14 }
   0xc   : > { %s768_s21 = smov (%p30_p0, %s29_s21), 0  ;;  %p76_p5 = scmp.eq.s32.totalorder %s351_s0, 0 }
   0xd   : > { %p613_p4 = por %p70_p2, %p69_p1  ;;  %s58_s24 = ssub.s32 %s539_s18, %s768_s21 }
   0xe   : > { %p127_p6 = scmp.eq.s32.totalorder %s351_s0, 1  ;;  %p60_p7 = scmp.eq.s32.totalorder %s58_s24, 0 }
   0xf   : > { %p619_p8 = por %p76_p5, %p75_p3  ;;  %p133_p10 = scmp.eq.s32.totalorder %s352_s20, 1 }
  0x10   : > { %p623_p9 = por %p127_p6, %p69_p1  ;;  %p378_p13 = scmp.lt.s32.totalorder %s543_s19, 2 }
  0x11   : > { %s628_s27 = scalar_select %p60_p7, %s531_s16, %s62_s22  }
  0x12   : > { %s754_s26 = scalar_select %p623_p9, 1, 0 }
  0x13   : > { %p630_p11 = por %p133_p10, %p75_p3  ;;  %s163_s29 = sand.u32 1, %s531_s16  }
  0x14   : > { %s356_s30 = sshll.u32 %s163_s29, 3  ;;  %s357_s4 = sshll.u32 %s539_s18, 7 }
  0x15   : > { %s755_s28 = scalar_select %p630_p11, 1, 0 }
  0x16   : > { %s641_s7 = scalar_lea.hbm %s748_s1, %s357_s4  ;;  %s167_s8 = scalar_lea.vmem [#allocation3], %s356_s30 }
  0x17   : > { %s176_s9 = sshll.u32 %s167_s8, 4  ;;  %p647_p0 = pnand %p378_p13, %p613_p4  ;;  %s643_s9 = int_to_ptr.vmem [resolvable:$true] %s176_s9 }
  0x18   : > { %s164_s11 = scalar_lea.sflag [#allocation4], %s163_s29  ;;  %s431_s12 = scalar_lea.hbm %s641_s7, 128 }
  0x19   : > { %p432_p3 = scmp.ne.s32.totalorder %s641_s7, %s431_s12  ;;  %p433_p5 = pneg %p647_p0 }
  0x1a   : > { %s436_s20 = scalar_lea.hbm %s748_s1, 256  ;;  %p437_p4 = scmp.lt.u32.totalorder %s641_s7, %s748_s1 }
  0x1b   : > { %p434_p6 = pnand %p433_p5, %p432_p3  ;;  %p438_p10 = scmp.lt.u32.totalorder %s436_s20, %s431_s12 }
  0x1c   : > { %p440_p12 = scmp.lt.u32.totalorder %s431_s12, %s641_s7 }
  0x1d   : > { %p435_p7 = pneg %p434_p6  ;;  %p439_p13 = por %p438_p10, %p437_p4 }
  0x1f   : > { %p441_p1 = por %p440_p12, %p439_p13 }
  0x21   : > { %p442_p2 = pnand %p441_p1, %p435_p7 }
  0x23   : > { %445 = shalt.err (!%p442_p2)
}
  0x24   : > { %s446_s24 = scalar_lea.vmem %s643_s9, 128  ;;  %s545_s29 = smov [#allocation3]  }
  0x25   : > { %p447_p3 = scmp.ne.s32.totalorder %s643_s9, %s446_s24  ;;  %s451_s30 = sshll.u32 %s545_s29, 4  ;;  %s452_s30 = int_to_ptr.vmem [resolvable:$false] %s451_s30 }
  0x26   : > { %s453_s4 = scalar_lea.vmem %s452_s30, 256  ;;  %p454_p9 = scmp.lt.s32.totalorder %s643_s9, %s452_s30 }
  0x27   : > { %p449_p6 = pnand %p447_p3, %p433_p5  ;;  %p455_p4 = scmp.lt.s32.totalorder %s453_s4, %s446_s24 }
  0x29   : > { %p450_p11 = pneg %p449_p6  ;;  %p456_p10 = por %p455_p4, %p454_p9 }
  0x2b   : > { %p457_p12 = pnand %p456_p10, %p450_p11 }
  0x2d   : > { %460 = shalt.err (!%p457_p12)
}
  0x2e   : > { %373 = dma.hbm_to_vmem [thread:$0]  (!%p647_p0), %s641_s7, 128, %s643_s9, %s164_s11  }
  0x2f   : > { %p757_p1 = scmp.lt.s32.totalorder %s543_s19, 3  ;;  %p758_p2 = scmp.ge.s32.totalorder %s543_s19, 1 }
  0x31   : > { %p182_p5 = pnand %p758_p2, %p757_p1 }
  0x32   : > { %s683_s5 = sand.u32 (!%p182_p5), 1, %s527_s15  }
  0x33   : > { %185 = sbr.rel (%p182_p5) target bundleno = 206 (0xce), region = 32  ;;  %s359_s6 = sshll.u32 (!%p182_p5), %s683_s5, 3 }
  0x34   : > { %s188_s8 = scalar_lea.sflag (!%p182_p5), [#allocation4], %s683_s5  ;;  %s191_s12 = scalar_lea.vmem (!%p182_p5), [#allocation3], %s359_s6 }
  0x3a   : > { %514 = dma.done.wait (%p619_p8), %s188_s8, 128  }
  0x3b   : > { %516 = vsyncadd (%p619_p8), %s188_s8, 4294967168  ;;  %v546_v0 = vmov 0   ;;  %v224_v1 = vld [vmem:[%s749_s2] sm:$0xff]  ;;  %s223_s10 = sld [smem:[#allocation2]]  ;;  %s363_s11 = sshll.u32 %s535_s17, 7  ;;  %v547_v6 = vmov 0.0  }
  0x3c   : > { %430 = vset.pattern.permute.xlu0 %v546_v0  ;;  %vm225_vm0 = vcmp.gt.f32.partialorder %v224_v1, 0.5  ;;  %v222_v3 = vld [vmem:[%s191_s12] sm:$0xff]  ;;  %s217_s25 = scalar_lea.vmem [#allocation6], %s359_s6  ;;  %s698_s22 = scalar_lea.hbm %s750_s3, %s363_s11 }
  0x3d   : > { %v231_v2 = vsel %vm225_vm0, 1, %v546_v0  ;;  %v230_v5 = vmax.f32 %v222_v3, 0.0  ;;  %s254_s13 = sshll.u32 %s217_s25, 4  ;;  %s239_s23 = scalar_lea.sflag [#allocation5], %s683_s5  ;;  %s700_s13 = int_to_ptr.vmem [resolvable:$true] %s254_s13 }
  0x3e   : > { %233 = vperm.xlu0 %430, %v231_v2   ;;  %s461_s17 = scalar_lea.vmem %s700_s13, 128  ;;  %p759_p9 = scmp.ne.s32.totalorder %s754_s26, 0 }
  0x3f   : > { %p462_p8 = scmp.ne.s32.totalorder %s700_s13, %s461_s17  ;;  %s548_s24 = smov [#allocation6]  }
  0x40   : > { %s465_s29 = sshll.u32 %s548_s24, 4  ;;  %s466_s29 = int_to_ptr.vmem [resolvable:$false] %s465_s29 }
  0x41   : > { %v226_v4 = vstv %s223_s10  ;;  %p463_p11 = pnand %p462_p8, %p759_p9  ;;  %s467_s30 = scalar_lea.vmem %s466_s29, 256 }
  0x42   : > { %vm227_vm1 = vcmp.gt.f32.partialorder %v222_v3, %v226_v4  ;;  %p468_p7 = scmp.lt.s32.totalorder %s700_s13, %s466_s29  ;;  %p469_p13 = scmp.lt.s32.totalorder %s467_s30, %s461_s17 }
  0x43   : > { %v361_v7 = vsel %vm227_vm1, 1.0, %v547_v6  ;;  %p464_p0 = pneg %p463_p11 }
  0x44   : > { %p470_p3 = por %p469_p13, %p468_p7 }
  0x46   : > { %p471_p6 = pnand %p470_p3, %p464_p0 }
  0xbd   : > { %v234_v8 = vpop.permute.xlu0 %233 }
  0xbe   : > { %vm235_vm2 = vcmp.eq.s32.totalorder %v234_v8, 1 }
  0xbf   : > { %v236_v9 = vsel %vm235_vm2, %v361_v7, %v230_v5 }
  0xc0   : > { %237 = vst [vmem:[%s217_s25] sm:$0xff] %v236_v9 }
  0xc1   : > { %474 = shalt.err (!%p471_p6)
}
  0xc2   : > { %s475_s4 = scalar_lea.hbm %s698_s22, 128  ;;  %s479_s8 = scalar_lea.hbm %s750_s3, 256 }
  0xc3   : > { %p476_p4 = scmp.ne.s32.totalorder %s698_s22, %s475_s4  ;;  %p480_p1 = scmp.lt.u32.totalorder %s698_s22, %s750_s3 }
  0xc4   : > { %p481_p2 = scmp.lt.u32.totalorder %s479_s8, %s475_s4  ;;  %p483_p8 = scmp.lt.u32.totalorder %s475_s4, %s698_s22 }
  0xc5   : > { %p477_p10 = pnand %p476_p4, %p759_p9 }
  0xc6   : > { %p482_p5 = por %p481_p2, %p480_p1 }
  0xc7   : > { %p478_p12 = pneg %p477_p10 }
  0xc8   : > { %p484_p11 = por %p483_p8, %p482_p5 }
  0xca   : > { %p485_p0 = pnand %p484_p11, %p478_p12 }
  0xcc   : > { %488 = shalt.err (!%p485_p0)
}
  0xcd   : > { %368 = dma.vmem_to_hbm [thread:$0]  (%p759_p9), %s700_s13, 128, %s698_s22, %s239_s23  }
  0xce PF: > { %s266_s9 = sand.u32 1, %s523_s14   ;;  %p760_p7 = scmp.ne.s32.totalorder %s755_s28, 0 }
  0xcf   : > { %p761_p13 = scmp.ge.s32.totalorder %s543_s19, 2  ;;  %s267_s10 = scalar_lea.sflag [#allocation5], %s266_s9 }
  0xd1   : > { %p375_p3 = pnand %p761_p13, %p760_p7 }
  0xd3   : > { %518 = dma.done.wait (!%p375_p3), %s267_s10, 128  }
  0xd4   : > { %520 = vsyncadd (!%p375_p3), %s267_s10, 4294967168  ;;  %s20_s19 = sadd.s32 1, %s543_s19   ;;  %s762_s14 = smov %s527_s15 }
  0xd5   : > { %p17_p6 = scmp.ge.s32.totalorder %s20_s19, 4   ;;  %s763_s15 = smov %s531_s16 }
  0xd6   : > { %s764_s16 = smov %s628_s27  ;;  %s765_s17 = smov %s539_s18 }
  0xd7   : > { %s766_s18 = smov %s768_s21  ;;  %19 = sbr.rel (!%p17_p6) target bundleno = 8 (0x8), region = 80 }
  0xde   :  { %272 = vsyncpa [#allocation4], 1 }
  0xdf   :  { %274 = vsyncpa [#allocation4 + $0x1], 1 }
  0xe0   :  { %275 = vsyncpa [#allocation5], 1 }
  0xe1   :  { %277 = vsyncpa [#allocation5 + $0x1], 1 }

</bundles_post_ra>
